<compile_context>
chip_gen: v6e
topology: v6e:2x2x1
jax: 0.10.0
libtpu: 0.0.40
codegen_flags: <defaults>
</compile_context>

<pallas_src>
import functools
import math

import jax
import jax.numpy as jnp
from jax.experimental import pallas as pl
from jax.experimental.pallas import tpu as pltpu


def _eca_kernel(coef_ref, x_ref, o_ref, *, k, pad):
    """coef_ref: (k, W) f32 masked half-taps; x_ref/o_ref: (R, W) row tiles."""
    x = x_ref[...].astype(jnp.float32)                  # (R, W)

    # Center tap: no shift needed.
    acc = x * coef_ref[pad:pad + 1, :]

    # Off-center taps: static lane shift; lanes whose source wrapped across a
    # channel-segment (or row) boundary are zeroed by the coefficient table,
    # which reproduces the conv's zero padding exactly.
    for j in range(k):                                  # k is tiny and static
        if j == pad:
            continue
        shifted = jnp.roll(x, pad - j, axis=1)
        acc = acc + shifted * coef_ref[j:j + 1, :]

    # sigmoid(z) = 0.5 * tanh(z / 2) + 0.5 ; the 0.5*w is pre-folded into coef,
    # so only one EUP tanh + one mul + one add remain here.
    gate = 0.5 * jnp.tanh(acc) + 0.5
    o_ref[...] = (x * gate).astype(o_ref.dtype)


def _tpu_budgets():
    """Generation-aware (tile_target_bytes, vmem_limit_bytes, min_grid_steps)."""
    try:
        vmem_phys = int(pltpu.get_tpu_info().vmem_capacity_bytes)
    except Exception:   # no TPU visible (e.g. interpret mode) -> conservative
        vmem_phys = None
    if vmem_phys is not None and vmem_phys >= 96 * 1024 * 1024:
        # v5e / v6e: 128 MiB physical VMEM, single TensorCore per chip.
        return 6 * 1024 * 1024, 64 * 1024 * 1024, 4
    # v7x (64 MiB per TC, 2 TCs) or unknown: keep headroom, want >= 8 steps.
    return 6 * 1024 * 1024, 48 * 1024 * 1024, 8


def _pick_tile_rows(n_rows, row_bytes, sublane, target_bytes, min_steps):
    """Rows per tile: ~target_bytes per buffer, sublane-aligned, and at least
    `min_steps` grid steps when possible (keeps both v7x TCs busy and the DMA
    pipeline deep).  Double-buffered in+out of this size stays well inside the
    per-generation VMEM limit."""
    if n_rows <= sublane:
        return int(n_rows)
    tr = (target_bytes // max(row_bytes, 1)) // sublane * sublane
    tr = max(sublane, tr)                  # extremely wide rows: one sublane group
    by_steps = -(-n_rows // min_steps)     # cdiv(n_rows, min_steps)
    by_steps = -(-by_steps // sublane) * sublane
    tr = min(tr, max(sublane, by_steps))
    return int(n_rows) if tr >= n_rows else int(tr)


@jax.jit
def eca_block(x, weight):
    """x: (B, C); weight: (k,) Conv1d taps.  Returns (B, C, 1, 1) like PyTorch."""
    B, C = x.shape
    k = int(weight.shape[0])
    pad = (k - 1) // 2

    # ---- lane-dense packing: g samples per row so width % 128 == 0 ----------
    g = 1
    if C % 128 != 0:
        g0 = 128 // math.gcd(C, 128)       # smallest g with (g*C) % 128 == 0
        if g0 > 1 and B % g0 == 0:
            g = g0
    # TODO(synk): when C % 128 != 0 and no packing group divides B, tiles stay
    # lane-sparse (masked stores); padding C up to a 128 multiple would cost a
    # full extra HBM read+write in the wrapper, so it is deliberately skipped.
    rows, width = B // g, g * C
    x2 = x.reshape(rows, width)            # contiguous -> free, no data movement

    # ---- per-tap coefficient rows: 0.5*w[j] where the tap is valid, else 0 --
    pos = jnp.arange(width, dtype=jnp.int32) % C        # channel within segment
    w32 = weight.astype(jnp.float32)
    coef_rows = []
    for j in range(k):
        s = pad - j                         # lane shift used for tap j
        if s > 0:
            valid = pos >= s
        elif s < 0:
            valid = pos < C + s
        else:
            valid = jnp.ones((width,), dtype=bool)
        coef_rows.append(jnp.where(valid, 0.5 * w32[j], 0.0))
    coef = jnp.stack(coef_rows, axis=0)     # (k, width) f32, a few KiB

    # ---- generation-aware tiling --------------------------------------------
    tile_target, vmem_limit, min_steps = _tpu_budgets()
    itemsize = jnp.dtype(x.dtype).itemsize
    sublane = max(8, 32 // itemsize)        # 8 f32 / 16 bf16 / 32 int8|fp8
    tile_rows = _pick_tile_rows(rows, width * itemsize, sublane, tile_target,
                                min_steps)
    grid = (pl.cdiv(rows, tile_rows),)

    out = pl.pallas_call(
        functools.partial(_eca_kernel, k=k, pad=pad),
        grid=grid,
        out_shape=jax.ShapeDtypeStruct((rows, width), x.dtype),
        in_specs=[
            # Coefficient table: constant index_map -> fetched once, stays in VMEM.
            pl.BlockSpec((k, width), lambda i: (0, 0)),
            # Streaming row tile (double-buffered by the Pallas pipeline).
            pl.BlockSpec((tile_rows, width), lambda i: (i, 0)),
        ],
        out_specs=pl.BlockSpec((tile_rows, width), lambda i: (i, 0)),
        compiler_params=pltpu.CompilerParams(
            dimension_semantics=("parallel",),   # shards steps across v7x's 2 TCs
            vmem_limit_bytes=vmem_limit,
        ),
    )(coef, x2)

    # Re-attach the trivial 1x1 spatial dims (PyTorch returns NCHW).
    return out.reshape(B, C, 1, 1)


if __name__ == "__main__":
    batch, channels = 8, 32
    gamma, b = 2, 1

    # Same kernel-size rule as ECABlock.__init__  -> k = 3 for C = 32.
    ksz = int(abs((math.log(channels, 2) + b) / gamma))
    ksz = ksz if ksz % 2 else ksz + 1

    key = jax.random.PRNGKey(0)
    kx, kw = jax.random.split(key)
    x = jax.random.normal(kx, (batch, channels), dtype=jnp.float32)

    # Deterministic Conv1d weight init (PyTorch default: U(-1/sqrt(fan_in), +)).
    bound = 1.0 / math.sqrt(ksz)
    w = jax.random.uniform(kw, (ksz,), minval=-bound, maxval=bound,
                           dtype=jnp.float32)

    out = jax.block_until_ready(eca_block(x, w))

    # Plain-JAX reference of the forward semantics.
    pad = (ksz - 1) // 2
    xp = jnp.pad(x, ((0, 0), (pad, pad)))
    v = sum(w[j] * xp[:, j:j + channels] for j in range(ksz))
    ref = (x * jax.nn.sigmoid(v)).reshape(batch, channels, 1, 1)

    assert out.shape == (batch, channels, 1, 1)
    assert jnp.allclose(out, ref, atol=1e-5, rtol=1e-4), \
        float(jnp.max(jnp.abs(out - ref)))

    print("KERNEL_OK")
</pallas_src>

<mosaic_0001>
module attributes {stable_mosaic.version = 11 : i64} {
  func.func @_eca_kernel(%arg0: i32, %arg1: memref<3x128xf32, #tpu.memory_space<vmem>>, %arg2: memref<2x128xf32, #tpu.memory_space<vmem>>, %arg3: memref<2x128xf32, #tpu.memory_space<vmem>>) attributes {dimension_semantics = [#tpu.dimension_semantics<parallel>], iteration_bounds = array<i64: 1>, scalar_prefetch = 0 : i64, scratch_operands = 0 : i64, tpu.core_type = #tpu.core_type<tc>, window_params = [{pipeline_mode = #tpu.pipeline_mode<synchronous>, transform_indices = @transform_0, window_bounds = array<i64: 3, 128>}, {transform_indices = @transform_1, window_bounds = array<i64: 2, 128>}, {transform_indices = @transform_2, window_bounds = array<i64: 2, 128>}]} {
    %c0 = arith.constant 0 : index
    %c0_0 = arith.constant 0 : index
    %0 = vector.load %arg2[%c0, %c0_0] : memref<2x128xf32, #tpu.memory_space<vmem>>, vector<2x128xf32>
    %c1 = arith.constant 1 : index
    %c0_1 = arith.constant 0 : index
    %1 = vector.load %arg1[%c1, %c0_1] : memref<3x128xf32, #tpu.memory_space<vmem>>, vector<1x128xf32>
    %2 = vector.broadcast %1 : vector<1x128xf32> to vector<2x128xf32>
    %3 = arith.mulf %0, %2 : vector<2x128xf32>
    %4 = vector.extract_strided_slice %0 {offsets = [0, 127], sizes = [2, 1], strides = [1, 1]} : vector<2x128xf32> to vector<2x1xf32>
    %5 = vector.extract_strided_slice %0 {offsets = [0, 0], sizes = [2, 127], strides = [1, 1]} : vector<2x128xf32> to vector<2x127xf32>
    %6 = tpu.concatenate %4, %5 in 1 : vector<2x1xf32>, vector<2x127xf32> -> vector<2x128xf32>
    %c0_2 = arith.constant 0 : index
    %c0_3 = arith.constant 0 : index
    %7 = vector.load %arg1[%c0_2, %c0_3] : memref<3x128xf32, #tpu.memory_space<vmem>>, vector<1x128xf32>
    %8 = vector.broadcast %7 : vector<1x128xf32> to vector<2x128xf32>
    %9 = arith.mulf %6, %8 : vector<2x128xf32>
    %10 = arith.addf %3, %9 : vector<2x128xf32>
    %11 = vector.extract_strided_slice %0 {offsets = [0, 1], sizes = [2, 127], strides = [1, 1]} : vector<2x128xf32> to vector<2x127xf32>
    %12 = vector.extract_strided_slice %0 {offsets = [0, 0], sizes = [2, 1], strides = [1, 1]} : vector<2x128xf32> to vector<2x1xf32>
    %13 = tpu.concatenate %11, %12 in 1 : vector<2x127xf32>, vector<2x1xf32> -> vector<2x128xf32>
    %c2 = arith.constant 2 : index
    %c0_4 = arith.constant 0 : index
    %14 = vector.load %arg1[%c2, %c0_4] : memref<3x128xf32, #tpu.memory_space<vmem>>, vector<1x128xf32>
    %15 = vector.broadcast %14 : vector<1x128xf32> to vector<2x128xf32>
    %16 = arith.mulf %13, %15 : vector<2x128xf32>
    %17 = arith.addf %10, %16 : vector<2x128xf32>
    %18 = math.tanh %17 : vector<2x128xf32>
    %cst = arith.constant 5.000000e-01 : f32
    %19 = vector.broadcast %cst : f32 to vector<2x128xf32>
    %20 = arith.mulf %19, %18 : vector<2x128xf32>
    %cst_5 = arith.constant 5.000000e-01 : f32
    %21 = vector.broadcast %cst_5 : f32 to vector<2x128xf32>
    %22 = arith.addf %20, %21 : vector<2x128xf32>
    %23 = arith.mulf %0, %22 : vector<2x128xf32>
    %c0_6 = arith.constant 0 : index
    %c0_7 = arith.constant 0 : index
    %24 = vector.load %arg3[%c0_6, %c0_7] : memref<2x128xf32, #tpu.memory_space<vmem>>, vector<2x128xf32>
    tpu.vector_store %arg3[%c0_6, %c0_7], %23 {strides = array<i32>} : memref<2x128xf32, #tpu.memory_space<vmem>>, vector<2x128xf32>,
    return
  }
  func.func @transform_0(%arg0: i32) -> (i32, i32) {
    %c0_i32 = arith.constant 0 : i32
    %c0_i32_0 = arith.constant 0 : i32
    %c0_i32_1 = arith.constant 0 : i32
    return %c0_i32, %c0_i32_0 : i32, i32
  }
  func.func @transform_1(%arg0: i32) -> (i32, i32) {
    %c0_i32 = arith.constant 0 : i32
    %c0_i32_0 = arith.constant 0 : i32
    return %arg0, %c0_i32 : i32, i32
  }
  func.func @transform_2(%arg0: i32) -> (i32, i32) {
    %c0_i32 = arith.constant 0 : i32
    %c0_i32_0 = arith.constant 0 : i32
    return %arg0, %c0_i32 : i32, i32
  }
}

</mosaic_0001>

<bundles_post_ra>
// kernel: eca_block.1
= control target key start
LH: loop header
LB: loop body
LE: loop exit
PB: predicated region body
PF: predicated region fallthrough
CT: control target
= control target key end

     0   :  { %s55_s11 = smov 1   ;;  %s56_s12 = smov 127   ;;  %s87_s1 = inlined_call_operand.vmem [shape: f32[2,128], index: 1, kind: input, shape index: {}]   ;;  %s88_s0 = inlined_call_operand.vmem [shape: f32[3,128], index: 0, kind: input, shape index: {}]   ;;  %s89_s2 = inlined_call_operand.vmem [shape: f32[2,128], index: 2, kind: output, shape index: {}]  }
   0x1   :  { %v11_v0 = vld [vmem:[%s87_s1] sm:$0x3]  ;;  %v50_v6 = vld [vmem:[%s88_s0 + $0x2] ss:$0 sm:$0xff] }
   0x2   :  { %19 = vrot.lane.b32.xlu0 %v11_v0, %s55_s11  ;;  %v48_v1 = vld [vmem:[%s88_s0 + $0x1] ss:$0 sm:$0xff]  ;;  %v49_v2 = vld [vmem:[%s88_s0] ss:$0 sm:$0xff] }
   0x3   :  { %v17_v4 = vmul.f32 %v48_v1, %v11_v0 }
   0x6   :  { %29 = vrot.lane.b32.xlu0 %v11_v0, %s56_s12 }
  0x74   :  { %v20_v3 = vpop.permute.xlu0 %19 }
  0x75   :  { %v27_v5 = vmul.f32 %v49_v2, %v20_v3 }
  0x77   :  { %v28_v8 = vadd.f32 %v27_v5, %v17_v4 }
  0x78   :  { %v30_v7 = vpop.permute.xlu0 %29 }
  0x79   :  { %v37_v9 = vmul.f32 %v50_v6, %v30_v7 }
  0x7b   :  { %v38_v10 = vadd.f32 %v37_v9, %v28_v8 }
  0x7d   :  { %53 = vtanh.f32 %v38_v10 }
  0x8a   :  { %v54_v11 = vpop.eup %53 }
  0x8b   :  { %v40_v12 = vmul.f32 0.5, %v54_v11 }
  0x8d   :  { %v41_v13 = vadd.f32 0.5, %v40_v12 }
  0x8f   :  { %v42_v14 = vmul.f32 %v41_v13, %v11_v0 }
  0x91   :  { %43 = vst [vmem:[%s89_s2] sm:$0x3] %v42_v14 }

</bundles_post_ra>
